<compile_context>
chip_gen: v5e
topology: v5e:2x2
jax: 0.10.0
libtpu: 0.0.40
codegen_flags: <defaults>
</compile_context>

<pallas_src>
import math

import jax
import jax.numpy as jnp
from jax.experimental import pallas as pl
from jax.experimental.pallas import tpu as pltpu


_VMEM_LIMIT_BYTES = 48 * 1024 * 1024   # safe on v5e/v6e (128 MiB) and v7x (64 MiB)
_FULL_K_MAX = 8192                      # single-tile K path up to this padded K


# ---------------------------------------------------------------------------
# Kernels
# ---------------------------------------------------------------------------

def _linear_kernel_fullk(x_ref, w_ref, o_ref):
    # x_ref: (tm, Kp) bf16, w_ref: (Kp, tn) bf16, o_ref: (tm, tn).
    # Whole reduction in one MXU call, f32 accumulation, single store.
    o_ref[...] = jnp.dot(
        x_ref[...], w_ref[...], preferred_element_type=jnp.float32
    ).astype(o_ref.dtype)


def _linear_kernel_ktiled(x_ref, w_ref, o_ref, acc_ref):
    # Fallback for very large K: grid axis 2 is the reduction; the output
    # block is resident across it and finalized on the last step.
    @pl.when(pl.program_id(2) == 0)
    def _():
        acc_ref[...] = jnp.zeros_like(acc_ref)

    acc_ref[...] += jnp.dot(
        x_ref[...], w_ref[...], preferred_element_type=jnp.float32
    )

    @pl.when(pl.program_id(2) == pl.num_programs(2) - 1)
    def _():
        o_ref[...] = acc_ref[...].astype(o_ref.dtype)


# ---------------------------------------------------------------------------
# Wrapper
# ---------------------------------------------------------------------------

def _round_up(x, m):
    return ((x + m - 1) // m) * m


def prepare_weight(weight: jax.Array) -> jax.Array:
    """One-time prep (hoisted out of the forward path): transpose the
    (vocab, n_embd) parameter to (K, N), zero-pad K/N up to multiples of 128
    (lane-dense output along vocab, exact zero-padded reduction) and cast to
    bf16 for the MXU."""
    N, K = weight.shape
    Kp = _round_up(K, 128)
    Np = _round_up(N, 128)
    wt = weight.T.astype(jnp.bfloat16)
    if (Kp, Np) != (K, N):
        wt = jnp.pad(wt, ((0, Kp - K), (0, Np - N)))
    return wt


def pallas_linear(x: jax.Array, w_kn: jax.Array, n_out: int) -> jax.Array:
    """y = x @ W.T given the pre-transposed / pre-padded bf16 weight w_kn.

    x: (..., n_embd), w_kn: (Kp, Np) bf16, returns (..., n_out) in x.dtype.
    """
    *lead, K = x.shape
    Kp, Np = w_kn.shape
    assert K <= Kp, "feature dim of x exceeds prepared weight"
    M = 1
    for d in lead:
        M *= d
    out_dtype = x.dtype

    # bf16 operands for the MXU (accumulation stays f32 inside the kernel).
    x2 = x.reshape(M, K).astype(jnp.bfloat16)
    if Kp != K:
        # Zero-pad K only (required for an exact reduction).  No M padding.
        x2 = jnp.pad(x2, ((0, 0), (0, Kp - K)))

    # --- tile selection -----------------------------------------------------
    if M >= 512:
        tm = 512                      # large M tile: weight re-reads = Mp/tm
    else:
        tm = M                        # single block == full dim (always legal)
    tn = 128
    for cand in (512, 256, 128):      # Np is a multiple of 128 by construction
        if Np % cand == 0:
            tn = cand
            break
    gm = pl.cdiv(M, tm)
    gn = Np // tn

    cost = pl.CostEstimate(
        flops=2 * M * n_out * K,
        transcendentals=0,
        bytes_accessed=int(
            M * K * 2 + K * n_out * 2 + M * n_out * jnp.dtype(out_dtype).itemsize
        ),
    )

    if Kp <= _FULL_K_MAX:
        # Single-tile K: no reduction axis, no scratch, no epilogue.
        # Grid ordered (j, i): weight block index (0, j) is constant across
        # the inner i axis, so Pallas skips re-DMAing the weight tile.
        out = pl.pallas_call(
            _linear_kernel_fullk,
            out_shape=jax.ShapeDtypeStruct((M, Np), out_dtype),
            grid_spec=pltpu.PrefetchScalarGridSpec(
                num_scalar_prefetch=0,
                grid=(gn, gm),
                in_specs=[
                    pl.BlockSpec((tm, Kp), lambda j, i: (i, 0)),
                    pl.BlockSpec((Kp, tn), lambda j, i: (0, j)),
                ],
                out_specs=pl.BlockSpec((tm, tn), lambda j, i: (i, j)),
            ),
            compiler_params=pltpu.CompilerParams(
                dimension_semantics=("parallel", "parallel"),
                vmem_limit_bytes=_VMEM_LIMIT_BYTES,
            ),
            cost_estimate=cost,
        )(x2, w_kn)
    else:
        # Fallback: K-tiled reduction (K last in the grid, "arbitrary").
        tk = 128
        for cand in (1024, 512, 256, 128):  # Kp is a multiple of 128
            if Kp % cand == 0:
                tk = cand
                break
        out = pl.pallas_call(
            _linear_kernel_ktiled,
            out_shape=jax.ShapeDtypeStruct((M, Np), out_dtype),
            grid_spec=pltpu.PrefetchScalarGridSpec(
                num_scalar_prefetch=0,
                grid=(gm, gn, Kp // tk),
                in_specs=[
                    pl.BlockSpec((tm, tk), lambda i, j, k: (i, k)),
                    pl.BlockSpec((tk, tn), lambda i, j, k: (k, j)),
                ],
                out_specs=pl.BlockSpec((tm, tn), lambda i, j, k: (i, j)),
                scratch_shapes=[pltpu.VMEM((tm, tn), jnp.float32)],
            ),
            compiler_params=pltpu.CompilerParams(
                dimension_semantics=("parallel", "parallel", "arbitrary"),
                vmem_limit_bytes=_VMEM_LIMIT_BYTES,
            ),
            cost_estimate=cost,
        )(x2, w_kn)

    if Np != n_out:
        out = out[:, :n_out]
    return out.reshape(*lead, n_out)


class LinearPallas:
    """Mirror of the PyTorch module: y = x @ W.T, no bias."""

    def __init__(self, n_embd: int, vocab_size: int, key):
        # nn.Linear default init: U(-1/sqrt(fan_in), 1/sqrt(fan_in)).
        bound = 1.0 / math.sqrt(n_embd)
        self.weight = jax.random.uniform(
            key, (vocab_size, n_embd), dtype=jnp.float32,
            minval=-bound, maxval=bound,
        )
        self.vocab_size = vocab_size
        # Hoisted out of the hot path: transpose + pad + bf16 cast, done once.
        self.weight_kn = prepare_weight(self.weight)

    def forward(self, x: jax.Array) -> jax.Array:
        return pallas_linear(x, self.weight_kn, self.vocab_size)

    __call__ = forward


if __name__ == "__main__":
    key = jax.random.PRNGKey(0)
    k_w, k_x = jax.random.split(key)

    # Small shapes consistent with the module: (batch=2, seq=8, n_embd=32),
    # vocab_size=256 (lane-dense output).
    n_embd, vocab_size = 32, 256
    batch, seq = 2, 8

    module = LinearPallas(n_embd, vocab_size, k_w)
    x = jax.random.normal(k_x, (batch, seq, n_embd), dtype=jnp.float32)

    out = jax.block_until_ready(module(x))
    assert out.shape == (batch, seq, vocab_size)
    assert out.dtype == x.dtype

    # Pure-JAX reference with matching internal precision:
    # bf16 operands, f32 accumulation.
    ref = jnp.einsum(
        "bsk,nk->bsn",
        x.astype(jnp.bfloat16),
        module.weight.astype(jnp.bfloat16),
        preferred_element_type=jnp.float32,
    )
    max_err = float(jnp.max(jnp.abs(out - ref)))
    assert jnp.allclose(out, ref, atol=1e-3, rtol=1e-3), max_err

    print("KERNEL_OK")
</pallas_src>

<mosaic_0001>
module attributes {stable_mosaic.version = 11 : i64} {
  func.func @_linear_kernel_fullk(%arg0: i32, %arg1: i32, %arg2: memref<16x128xbf16, #tpu.memory_space<vmem>>, %arg3: memref<128x256xbf16, #tpu.memory_space<vmem>>, %arg4: memref<16x256xf32, #tpu.memory_space<vmem>>) attributes {dimension_semantics = [#tpu.dimension_semantics<parallel>, #tpu.dimension_semantics<parallel>], iteration_bounds = array<i64: 1, 1>, scalar_prefetch = 0 : i64, scratch_operands = 0 : i64, tpu.core_type = #tpu.core_type<tc>, window_params = [{transform_indices = @transform_0, window_bounds = array<i64: 16, 128>}, {transform_indices = @transform_1, window_bounds = array<i64: 128, 256>}, {transform_indices = @transform_2, window_bounds = array<i64: 16, 256>}]} {
    %c0 = arith.constant 0 : index
    %c0_0 = arith.constant 0 : index
    %0 = vector.load %arg2[%c0, %c0_0] : memref<16x128xbf16, #tpu.memory_space<vmem>>, vector<16x128xbf16>
    %c0_1 = arith.constant 0 : index
    %c0_2 = arith.constant 0 : index
    %1 = vector.load %arg3[%c0_1, %c0_2] : memref<128x256xbf16, #tpu.memory_space<vmem>>, vector<128x256xbf16>
    %cst = arith.constant dense<0.000000e+00> : vector<16x256xf32>
    %2 = tpu.matmul %0, %1, %cst {dimension_numbers = #tpu.dot_dimension_numbers<[1], [0], [0], [1], [0, 0, 1, 1], [], []>} : vector<16x128xbf16>, vector<128x256xbf16>, vector<16x256xf32> -> vector<16x256xf32>
    %c0_3 = arith.constant 0 : index
    %c0_4 = arith.constant 0 : index
    %3 = vector.load %arg4[%c0_3, %c0_4] : memref<16x256xf32, #tpu.memory_space<vmem>>, vector<16x256xf32>
    tpu.vector_store %arg4[%c0_3, %c0_4], %2 {strides = array<i32>} : memref<16x256xf32, #tpu.memory_space<vmem>>, vector<16x256xf32>,
    return
  }
  func.func @transform_0(%arg0: i32, %arg1: i32) -> (i32, i32) {
    %c0_i32 = arith.constant 0 : i32
    %c0_i32_0 = arith.constant 0 : i32
    return %arg1, %c0_i32 : i32, i32
  }
  func.func @transform_1(%arg0: i32, %arg1: i32) -> (i32, i32) {
    %c0_i32 = arith.constant 0 : i32
    %c0_i32_0 = arith.constant 0 : i32
    return %c0_i32, %arg0 : i32, i32
  }
  func.func @transform_2(%arg0: i32, %arg1: i32) -> (i32, i32) {
    %c0_i32 = arith.constant 0 : i32
    return %arg1, %arg0 : i32, i32
  }
}

</mosaic_0001>

<bundles_post_ra>
// kernel: tpu_custom_call.1
= control target key start
LH: loop header
LB: loop body
LE: loop exit
PB: predicated region body
PF: predicated region fallthrough
CT: control target
= control target key end

     0   :  { %7 = vsyncpa [#allocation3], 0  ;;  %s405_s0 = inlined_call_operand.hbm [shape: bf16[16,128], index: 0, kind: input, shape index: {}]   ;;  %s406_s1 = inlined_call_operand.hbm [shape: bf16[128,256], index: 1, kind: input, shape index: {}]   ;;  %s407_s2 = inlined_call_operand.hbm [shape: f32[16,256], index: 2, kind: output, shape index: {}]  }
   0x1   :  { %8 = vsyncpa [#allocation6], 0 }
   0x2   :  { %9 = vsyncpa [#allocation4], 0  ;;  %s14_s11 = sshll.u32 %s405_s0, 4  ;;  %s372_s12 = smov [#allocation2]   ;;  %s15_s11 = int_to_ptr.hbm [resolvable:$true] %s14_s11 }
   0x3   :  { %s16_s13 = sshll.u32 %s372_s12, 4  ;;  %s27_s16 = sshll.u32 %s406_s1, 4  ;;  %s17_s13 = int_to_ptr.vmem [resolvable:$true] %s16_s13  ;;  %s28_s16 = int_to_ptr.hbm [resolvable:$true] %s27_s16 }
   0x4   :  { %s373_s17 = smov 64   ;;  %s374_s18 = smov 4  }
   0x5   :  { %22 = dma.hbm_to_vmem [thread:$0]  %s15_s11, 128, %s17_s13, [#allocation3], %s373_s17, %s373_s17, %s374_s18  }
   0x6   :  { %s375_s19 = smov [#allocation5]   ;;  %s376_s21 = smov 128  }
   0x7   :  { %s29_s20 = sshll.u32 %s375_s19, 4  ;;  %s377_s22 = smov 8   ;;  %s30_s20 = int_to_ptr.vmem [resolvable:$true] %s29_s20 }
   0x8   :  { %35 = dma.hbm_to_vmem [thread:$0]  %s28_s16, 2048, %s30_s20, [#allocation6], %s376_s21, %s376_s21, %s377_s22  }
   0x9   :  { %366 = dma.done.wait [#allocation3], 128  }
   0xa   :  { %367 = vsyncadd [#allocation3], 4294967168 }
   0xb   :  { %368 = dma.done.wait [#allocation6], 2048  }
   0xc   :  { %369 = vsyncadd [#allocation6], 4294965248  ;;  %v262_v0 = vld [vmem:[#allocation5 + $0x70] sm:$0xf]  ;;  %v284_v1 = vld [vmem:[#allocation5 + $0x74] sm:$0xf0] }
   0xd   :  { %v283_v2 = vld [vmem:[#allocation5 + $0x74] sm:$0xf]  ;;  %v263_v3 = vor.u32 %v284_v1, %v262_v0  ;;  %v264_v4 = vld [vmem:[#allocation5 + $0x78] sm:$0xf0]  ;;  %v254_v5 = vld [vmem:[#allocation5 + $0x60] sm:$0xf] }
   0xe   :  { %v282_v6 = vld [vmem:[#allocation5 + $0x64] sm:$0xf0]  ;;  %v267_v7 = vor.u32 %v283_v2, %v264_v4  ;;  %v281_v8 = vld [vmem:[#allocation5 + $0x64] sm:$0xf]  ;;  %v256_v9 = vld [vmem:[#allocation5 + $0x68] sm:$0xf0] }
   0xf   :  { %148 = vmatpush.bf16.msra.mxu0 %v263_v3  ;;  %v255_v10 = vor.u32 %v282_v6, %v254_v5  ;;  %v259_v11 = vor.u32 %v281_v8, %v256_v9  ;;  %v246_v12 = vld [vmem:[#allocation5 + $0x50] sm:$0xf]  ;;  %v280_v13 = vld [vmem:[#allocation5 + $0x54] sm:$0xf0]  ;;  %v279_v14 = vld [vmem:[#allocation5 + $0x54] sm:$0xf] }
  0x10   :  { %162 = vmatpush.bf16.msra.mxu1 %v267_v7  ;;  %v248_v15 = vld [vmem:[#allocation5 + $0x58] sm:$0xf0]  ;;  %v247_v16 = vor.u32 %v280_v13, %v246_v12  ;;  %v238_v18 = vld [vmem:[#allocation5 + $0x40] sm:$0xf]  ;;  %v278_v19 = vld [vmem:[#allocation5 + $0x44] sm:$0xf0] }
  0x11   :  { %v251_v17 = vor.u32 %v279_v14, %v248_v15  ;;  %v277_v20 = vld [vmem:[#allocation5 + $0x44] sm:$0xf]  ;;  %v240_v21 = vld [vmem:[#allocation5 + $0x48] sm:$0xf0]  ;;  %v239_v22 = vor.u32 %v278_v19, %v238_v18  ;;  %v230_v24 = vld [vmem:[#allocation5 + $0x30] sm:$0xf] }
  0x12   :  { %v243_v23 = vor.u32 %v277_v20, %v240_v21  ;;  %v276_v25 = vld [vmem:[#allocation5 + $0x34] sm:$0xf0]  ;;  %v275_v26 = vld [vmem:[#allocation5 + $0x34] sm:$0xf]  ;;  %v232_v27 = vld [vmem:[#allocation5 + $0x38] sm:$0xf0] }
  0x13   :  { %149 = vmatpush.bf16.msra.mxu0 %v255_v10  ;;  %v231_v28 = vor.u32 %v276_v25, %v230_v24  ;;  %v235_v29 = vor.u32 %v275_v26, %v232_v27  ;;  %v222_v30 = vld [vmem:[#allocation5 + $0x20] sm:$0xf]  ;;  %v274_v31 = vld [vmem:[#allocation5 + $0x24] sm:$0xf0]  ;;  %v273_v32 = vld [vmem:[#allocation5 + $0x24] sm:$0xf] }
  0x14   :  { %163 = vmatpush.bf16.msra.mxu1 %v259_v11  ;;  %v224_v33 = vld [vmem:[#allocation5 + $0x28] sm:$0xf0]  ;;  %v223_v34 = vor.u32 %v274_v31, %v222_v30  ;;  %v214_v36 = vld [vmem:[#allocation5 + $0x10] sm:$0xf]  ;;  %v272_v37 = vld [vmem:[#allocation5 + $0x14] sm:$0xf0] }
  0x15   :  { %v227_v35 = vor.u32 %v273_v32, %v224_v33  ;;  %v271_v38 = vld [vmem:[#allocation5 + $0x14] sm:$0xf]  ;;  %v216_v39 = vld [vmem:[#allocation5 + $0x18] sm:$0xf0]  ;;  %v215_v40 = vor.u32 %v272_v37, %v214_v36  ;;  %v206_v42 = vld [vmem:[#allocation5] sm:$0xf] }
  0x16   :  { %v219_v41 = vor.u32 %v271_v38, %v216_v39  ;;  %v270_v43 = vld [vmem:[#allocation5 + $0x4] sm:$0xf0]  ;;  %v269_v44 = vld [vmem:[#allocation5 + $0x4] sm:$0xf]  ;;  %v208_v45 = vld [vmem:[#allocation5 + $0x8] sm:$0xf0] }
  0x17   :  { %150 = vmatpush.bf16.msra.mxu0 %v247_v16  ;;  %v207_v46 = vor.u32 %v270_v43, %v206_v42  ;;  %v211_v47 = vor.u32 %v269_v44, %v208_v45  ;;  %v268_v48 = vld [vmem:[#allocation2] sm:$0xff]  ;;  %s378_s0 = smov [#allocation7]   ;;  %s186_s25 = sshll.u32 %s407_s2, 4  ;;  %s187_s25 = int_to_ptr.hbm [resolvable:$true] %s186_s25 }
  0x18   :  { %164 = vmatpush.bf16.msra.mxu1 %v251_v17  ;;  %s184_s1 = sshll.u32 %s378_s0, 4  ;;  %s379_s26 = smov 256   ;;  %s185_s1 = int_to_ptr.vmem [resolvable:$true] %s184_s1 }
  0x19   :  { %s380_s27 = smov 16  }
  0x1b   :  { %151 = vmatpush.bf16.msra.mxu0 %v239_v22 }
  0x1c   :  { %165 = vmatpush.bf16.msra.mxu1 %v243_v23 }
  0x1f   :  { %152 = vmatpush.bf16.msra.mxu0 %v231_v28 }
  0x20   :  { %166 = vmatpush.bf16.msra.mxu1 %v235_v29 }
  0x23   :  { %153 = vmatpush.bf16.msra.mxu0 %v223_v34 }
  0x24   :  { %167 = vmatpush.bf16.msra.mxu1 %v227_v35 }
  0x27   :  { %154 = vmatpush.bf16.msra.mxu0 %v215_v40 }
  0x28   :  { %168 = vmatpush.bf16.msra.mxu1 %v219_v41 }
  0x2b   :  { %155 = vmatpush.bf16.msra.mxu0 %v207_v46 }
  0x2c   :  { %169 = vmatpush.bf16.msra.mxu1 %v211_v47 }
  0x2e   :  { %156 = vmatmul.bf16.vlgmr.msra.gmra.mxu0 %v268_v48 }
  0x2f   :  { %170 = vmatmul.bf16.vlgmr.msra.gmra.mxu1 %v268_v48 }
  0xab   :  { %v157_v49 = vpop.f32.mrf.mxu0 }
  0xac   :  { %176 = vst [vmem:[#allocation7] sm:$0xff] %v157_v49  ;;  %v171_v50 = vpop.f32.mrf.mxu1 }
  0xad   :  { %177 = vst [vmem:[#allocation7 + $0x8] sm:$0xff] %v171_v50 }
  0xb3   :  { %v159_v51 = vpop.f32.mrf.mxu0 }
  0xb4   :  { %178 = vst [vmem:[#allocation7 + $0x10] sm:$0xff] %v159_v51  ;;  %v173_v52 = vpop.f32.mrf.mxu1 }
  0xb5   :  { %179 = vst [vmem:[#allocation7 + $0x18] sm:$0xff] %v173_v52 }
  0xb6   :  { %192 = dma.vmem_to_hbm [thread:$0]  %s185_s1, 512, %s187_s25, [#allocation4], %s379_s26, %s379_s26, %s380_s27  }
  0xb7   :  { %370 = dma.done.wait [#allocation4], 512  }
  0xb8   :  { %371 = vsyncadd [#allocation4], 4294966784 }
  0xb9   :  { %197 = vsyncpa [#allocation3], 1 }
  0xba   :  { %198 = vsyncpa [#allocation6], 1 }
  0xbb   :  { %199 = vsyncpa [#allocation4], 1 }

</bundles_post_ra>
